<compile_context>
chip_gen: v7x
topology: tpu7x:2x2x1
jax: 0.10.0
libtpu: 0.0.40
codegen_flags: <defaults>
</compile_context>

<pallas_src>
import jax
import jax.numpy as jnp
from jax.experimental import pallas as pl
from jax.experimental.pallas import tpu as pltpu

HIDDEN_DIMS = (64, 64, 64)   # DeepLinearNet default hidden sizes
_LANES = 128                 # TPU vreg lane width


def _round_up(x: int, m: int) -> int:
    return ((x + m - 1) // m) * m


def _pick_tiling() -> tuple[int, int]:
    """(tile_rows, vmem_limit_bytes) per TPU generation.

    VMEM accounting per grid step (double-buffered):
      input  2 * tile_r * 128 * 4 B
      output 2 * tile_r * 128 * 4 B   (fold=8 lanes padded to 128 -> same as input)
      + G (128 x 8 f32, negligible) + SMEM bias.
    """
    try:
        kind = jax.devices()[0].device_kind.lower()
    except Exception:  # pragma: no cover - defensive
        kind = ""
    if "v5 lite" in kind or "v5lite" in kind or "v5e" in kind:
        # ~0.8 TB/s HBM: 2 MiB tiles already amortize the ~0.35 us step overhead.
        return 4096, 16 << 20
    if "v6" in kind:
        # 1.4 TB/s HBM, 128 MiB physical VMEM: big tiles, raise the scoped limit.
        return 16384, 64 << 20
    if "v7" in kind or "7x" in kind:
        # 3.2 TB/s HBM but only 64 MiB physical VMEM: ~33 MiB used, stay under 64.
        return 16384, 48 << 20
    # Unknown chip: 8192 rows -> ~16 MiB, within a 32 MiB scoped limit everywhere.
    return 8192, 32 << 20


def _collapse_weights(mats):
    """One-time DeepLinearNet collapse: w_eff = M3@M2@M1@M0, squared (non_negative)."""
    m0, m1, m2, m3 = mats
    hi = jax.lax.Precision.HIGHEST
    w = jnp.matmul(m3, m2, precision=hi)
    w = jnp.matmul(w, m1, precision=hi)
    w = jnp.matmul(w, m0, precision=hi)          # [1, K]
    return (w * w).reshape(-1).astype(jnp.float32)


def _distance_agg_kernel(x_ref, g_ref, b_ref, o_ref):
    """One batch tile of the collapsed linear map.

    x_ref : [tile_r, F*K]  F samples lane-folded per row (streamed, pipelined)
    g_ref : [F*K, F]       squared collapsed weights fused with group-sum (resident)
    b_ref : [1, 1]  SMEM   scalar bias
    o_ref : [tile_r, F]    per-sample aggregated distances (unfolded in the wrapper)
    """
    x = x_ref[...].astype(jnp.float32)           # exact upcast if input is bf16
    acc = jnp.dot(x, g_ref[...],
                  preferred_element_type=jnp.float32,
                  precision=jax.lax.Precision.HIGHEST)
    o_ref[...] = (acc + b_ref[0, 0]).astype(o_ref.dtype)


def init_distance_aggregator_params(key, num_quasipartition_mixtures: int):
    """Deterministic synthetic init of DeepLinearNet(K -> 1, hidden [64,64,64])."""
    dims = [num_quasipartition_mixtures, *HIDDEN_DIMS, 1]
    keys = jax.random.split(key, len(dims) - 1)
    mats = []
    for i, k in enumerate(keys):
        fan_in, fan_out = dims[i], dims[i + 1]
        bound = 1.0 / jnp.sqrt(jnp.float32(fan_in))
        mats.append(
            jax.random.uniform(k, (fan_out, fan_in), jnp.float32, -bound, bound)
        )
    bias = jnp.zeros((1, 1), jnp.float32)
    return mats, bias


@jax.jit
def distance_aggregator_forward(expected_quasipartitions, mats, bias):
    """expected_quasipartitions: [..., K] -> [...] float32."""
    x = expected_quasipartitions
    k = x.shape[-1]
    batch_shape = x.shape[:-1]
    x2d = x.reshape(-1, k)                       # row-major reshape: free, keeps dtype
    b = x2d.shape[0]

    # ---- one-time deep-linear collapse (hoisted off the per-tile path) ----
    w_sq = _collapse_weights(mats)               # [K]
    bias2d = bias.reshape(1, 1).astype(jnp.float32)

    # ---- lane-fold: F samples of K features per 128-lane row ----
    fold = _LANES // k if (_LANES % k == 0) else 1
    kf = k * fold

    # fused (squared weights x group-sum) matrix: G[f*K + j, f] = w_sq[j]
    g = jnp.kron(jnp.eye(fold, dtype=jnp.float32), w_sq.reshape(k, 1))  # [KF, F]

    # ---- pad ONLY to a multiple of fold, ONLY when needed (<= fold-1 samples).
    # Common case b % fold == 0: zero-copy.  Partial last grid block is masked
    # by Pallas, so no padding to a tile multiple is ever required.
    pad = (-b) % fold
    if pad:
        x2d = jnp.pad(x2d, ((0, pad), (0, 0)))
    rows = (b + pad) // fold
    x_fold = x2d.reshape(rows, kf)

    tile_rows, vmem_limit = _pick_tiling()
    tile_r = min(tile_rows, _round_up(rows, 16))  # 16-row alignment covers bf16 packing
    grid = (pl.cdiv(rows, tile_r),)               # partial last block handled by masking

    cost = pl.CostEstimate(
        flops=2 * rows * kf * fold,
        transcendentals=0,
        bytes_accessed=int(
            x_fold.size * x_fold.dtype.itemsize   # streamed input
            + g.size * 4 + 4                      # resident weights + bias
            + rows * fold * 4                     # output
        ),
    )

    out = pl.pallas_call(
        _distance_agg_kernel,
        out_shape=jax.ShapeDtypeStruct((rows, fold), jnp.float32),
        grid=grid,
        in_specs=[
            pl.BlockSpec((tile_r, kf), lambda i: (i, 0)),      # streamed x tiles
            pl.BlockSpec((kf, fold), lambda i: (0, 0)),        # VMEM-resident weights
            pl.BlockSpec((1, 1), lambda i: (0, 0),
                         memory_space=pltpu.MemorySpace.SMEM),  # scalar bias
        ],
        out_specs=pl.BlockSpec((tile_r, fold), lambda i: (i, 0)),
        compiler_params=pltpu.CompilerParams(
            dimension_semantics=("parallel",),
            vmem_limit_bytes=vmem_limit),
        cost_estimate=cost,
    )(x_fold, g, bias2d)

    # undo fold + (tiny) pad; .squeeze(-1) from the PyTorch forward.
    return out.reshape(-1)[:b].reshape(batch_shape)


if __name__ == "__main__":
    NUM_MIXTURES = 16            # num_quasipartition_mixtures
    BATCH = (2, 8)               # arbitrary leading dims, as in the torch module

    root = jax.random.PRNGKey(0)
    k_param, k_x, k_x2 = jax.random.split(root, 3)

    mats, bias = init_distance_aggregator_params(k_param, NUM_MIXTURES)
    # expected quasipartitions live in [0, 1]
    x = jax.random.uniform(k_x, BATCH + (NUM_MIXTURES,), jnp.float32)

    y = distance_aggregator_forward(x, mats, bias)
    y = jax.block_until_ready(y)
    assert y.shape == BATCH, y.shape

    # Pure-JAX reference of the same semantics (elementwise f32, no MXU ambiguity).
    w_sq_ref = _collapse_weights(mats)                               # [K]
    y_ref = jnp.sum(x * w_sq_ref, axis=-1) + bias[0, 0]
    assert jnp.allclose(y, y_ref, atol=1e-5, rtol=1e-5)

    # Ragged batch (b % fold != 0) exercises the tiny fold-pad + partial-block path.
    x2 = jax.random.uniform(k_x2, (3, 5, NUM_MIXTURES), jnp.float32)
    y2 = jax.block_until_ready(distance_aggregator_forward(x2, mats, bias))
    y2_ref = jnp.sum(x2 * w_sq_ref, axis=-1) + bias[0, 0]
    assert y2.shape == (3, 5)
    assert jnp.allclose(y2, y2_ref, atol=1e-5, rtol=1e-5)

    # bf16 inputs stream at half the HBM cost and are upcast once in-kernel.
    y3 = jax.block_until_ready(
        distance_aggregator_forward(x.astype(jnp.bfloat16), mats, bias))
    y3_ref = jnp.sum(x.astype(jnp.bfloat16).astype(jnp.float32) * w_sq_ref,
                     axis=-1) + bias[0, 0]
    assert jnp.allclose(y3, y3_ref, atol=1e-5, rtol=1e-5)

    print("KERNEL_OK")
</pallas_src>

<mosaic_0001>
module attributes {stable_mosaic.version = 11 : i64} {
  func.func @_distance_agg_kernel(%arg0: i32, %arg1: memref<16x128xf32, #tpu.memory_space<vmem>>, %arg2: memref<128x8xf32, #tpu.memory_space<vmem>>, %arg3: memref<1x1xf32, #tpu.memory_space<smem>>, %arg4: memref<16x8xf32, #tpu.memory_space<vmem>>) attributes {dimension_semantics = [#tpu.dimension_semantics<parallel>], iteration_bounds = array<i64: 1>, scalar_prefetch = 0 : i64, scratch_operands = 0 : i64, tpu.core_type = #tpu.core_type<tc>, window_params = [{transform_indices = @transform_0, window_bounds = array<i64: 16, 128>}, {pipeline_mode = #tpu.pipeline_mode<synchronous>, transform_indices = @transform_1, window_bounds = array<i64: 128, 8>}, {transform_indices = @transform_2, window_bounds = array<i64: 1, 1>}, {transform_indices = @transform_3, window_bounds = array<i64: 16, 8>}]} {
    %c0 = arith.constant 0 : index
    %c0_0 = arith.constant 0 : index
    %0 = vector.load %arg1[%c0, %c0_0] : memref<16x128xf32, #tpu.memory_space<vmem>>, vector<16x128xf32>
    %c0_1 = arith.constant 0 : index
    %c0_2 = arith.constant 0 : index
    %1 = vector.load %arg2[%c0_1, %c0_2] : memref<128x8xf32, #tpu.memory_space<vmem>>, vector<128x8xf32>
    %cst = arith.constant dense<0.000000e+00> : vector<16x8xf32>
    %2 = tpu.matmul %0, %1, %cst {dimension_numbers = #tpu.dot_dimension_numbers<[1], [0], [0], [1], [0, 0, 1, 1], [], []>, precision = #tpu.contract_precision<fp32>} : vector<16x128xf32>, vector<128x8xf32>, vector<16x8xf32> -> vector<16x8xf32>
    %c0_3 = arith.constant 0 : index
    %c0_4 = arith.constant 0 : index
    %3 = memref.load %arg3[%c0_3, %c0_4] : memref<1x1xf32, #tpu.memory_space<smem>>
    %4 = vector.broadcast %3 : f32 to vector<16x8xf32>
    %5 = arith.addf %2, %4 : vector<16x8xf32>
    %c0_5 = arith.constant 0 : index
    %c0_6 = arith.constant 0 : index
    %6 = vector.load %arg4[%c0_5, %c0_6] : memref<16x8xf32, #tpu.memory_space<vmem>>, vector<16x8xf32>
    tpu.vector_store %arg4[%c0_5, %c0_6], %5 {strides = array<i32>} : memref<16x8xf32, #tpu.memory_space<vmem>>, vector<16x8xf32>,
    return
  }
  func.func @transform_0(%arg0: i32) -> (i32, i32) {
    %c0_i32 = arith.constant 0 : i32
    %c0_i32_0 = arith.constant 0 : i32
    return %arg0, %c0_i32 : i32, i32
  }
  func.func @transform_1(%arg0: i32) -> (i32, i32) {
    %c0_i32 = arith.constant 0 : i32
    %c0_i32_0 = arith.constant 0 : i32
    %c0_i32_1 = arith.constant 0 : i32
    return %c0_i32, %c0_i32_0 : i32, i32
  }
  func.func @transform_2(%arg0: i32) -> (i32, i32) {
    %c0_i32 = arith.constant 0 : i32
    %c0_i32_0 = arith.constant 0 : i32
    %c0_i32_1 = arith.constant 0 : i32
    return %c0_i32, %c0_i32_0 : i32, i32
  }
  func.func @transform_3(%arg0: i32) -> (i32, i32) {
    %c0_i32 = arith.constant 0 : i32
    %c0_i32_0 = arith.constant 0 : i32
    return %arg0, %c0_i32 : i32, i32
  }
}

</mosaic_0001>

<bundles_post_ra>
// kernel: mul.7
= control target key start
LH: loop header
LB: loop body
LE: loop exit
PB: predicated region body
PF: predicated region fallthrough
CT: control target
= control target key end

     0   :  { %s34_s0 = inlined_call_operand.vmem [shape: f32[16], index: 0, kind: input, shape index: {}, may-alias: {0,1}]   ;;  %s35_s1 = inlined_call_operand.vmem [shape: f32[16], index: 1, kind: input, shape index: {}, may-alias: {0,1}]   ;;  %s36_s2 = inlined_call_operand.vmem [shape: f32[16], index: 2, kind: output, shape index: {}]  }
   0x1   :  { %v3_v0 = vld [vmem:[%s34_s0] sm:$0x1] }
   0x2   :  { %v4_v1 = vld [vmem:[%s35_s1] sm:$0x1] }
   0x3   :  { %v7_v2 = vmul.f32 %v4_v1, %v3_v0 }
   0x5   :  { %9 = vst [vmem:[%s36_s2] sm:$0x1] %v7_v2 }

// kernel: distance_aggregator_forward.1
= control target key start
LH: loop header
LB: loop body
LE: loop exit
PB: predicated region body
PF: predicated region fallthrough
CT: control target
= control target key end

     0   :  { %9 = vsyncpa [#allocation4], 0  ;;  %vm720_vm0 = vcmask 64512   ;;  %s1646_s0 = inlined_call_operand.vmem [shape: f32[2,128], index: 0, kind: input, shape index: {}]   ;;  %s1647_s1 = inlined_call_operand.vmem [shape: f32[128,8], index: 1, kind: input, shape index: {}]   ;;  %s1648_s2 = inlined_call_operand.<no memory space> [shape: f32[1,1], index: 2, kind: input, shape index: {}]   ;;  %s1649_s3 = inlined_call_operand.hbm [shape: f32[2,8], index: 3, kind: output, shape index: {}]  }
   0x1   :  { %v18_v0 = vld [vmem:[%s1647_s1] sm:$0xff]  ;;  %v19_v1 = vld [vmem:[%s1647_s1 + $0x8] sm:$0xff]  ;;  %v20_v4 = vld [vmem:[%s1647_s1 + $0x10] sm:$0xff] }
   0x2   :  { %v37_v2 = vand.u32 4294901760, %v18_v0  ;;  %v40_v3 = vand.u32 4294901760, %v19_v1  ;;  %v1323_v5 = vld [vmem:[%s1647_s1 + $0x18] sm:$0xff]  ;;  %v1328_v6 = vld [vmem:[%s1647_s1 + $0x20] sm:$0xff]  ;;  %v43_v7 = vand.u32 4294901760, %v20_v4  ;;  %v1334_v9 = vld [vmem:[%s1647_s1 + $0x28] sm:$0xff] }
   0x3   :  { %v46_v8 = vand.u32 4294901760, %v1323_v5  ;;  %v49_v11 = vand.u32 4294901760, %v1328_v6  ;;  %v52_v12 = vand.u32 4294901760, %v1334_v9  ;;  %v1345_v14 = vld [vmem:[%s1647_s1 + $0x30] sm:$0xff]  ;;  %v1350_v15 = vld [vmem:[%s1647_s1 + $0x38] sm:$0xff]  ;;  %v16_v16 = vld [vmem:[%s1646_s0] sm:$0xff] }
   0x4   :  { %v1336_v10 = vpack.c.bf16 %v40_v3, %v37_v2  ;;  %v55_v18 = vand.u32 4294901760, %v1345_v14  ;;  %v58_v19 = vand.u32 4294901760, %v1350_v15  ;;  %v1369_v20 = vand.u32 4294901760, %v16_v16  ;;  %v1374_v21 = vld [vmem:[%s1647_s1 + $0x40] sm:$0xff]  ;;  %v1379_v22 = vld [vmem:[%s1647_s1 + $0x48] sm:$0xff]  ;;  %v1400_v28 = vld [vmem:[%s1647_s1 + $0x50] sm:$0xff] }
   0x5   :  { %v1340_v13 = vpack.c.bf16 %v46_v8, %v43_v7  ;;  %v1365_v17 = vpack.c.bf16 %v52_v12, %v49_v11  ;;  %v61_v25 = vand.u32 4294901760, %v1374_v21  ;;  %v64_v26 = vand.u32 4294901760, %v1379_v22  ;;  %v1405_v29 = vld [vmem:[%s1647_s1 + $0x58] sm:$0xff]  ;;  %v17_v33 = vld [vmem:[%s1646_s0 + $0x8] sm:$0xff]  ;;  %v1430_v38 = vld [vmem:[%s1647_s1 + $0x60] sm:$0xff] }
   0x6   :  { %1058 = vmatprep.subr.bf16.mxu1 %v1336_v10  ;;  %1154 = vmatprep.subr.bf16.mxu0 %v1336_v10  ;;  %v1382_v23 = vsub.f32 %v16_v16, %v1369_v20  ;;  %v1392_v24 = vpack.c.bf16 %v58_v19, %v55_v18  ;;  %v1408_v31 = vsub.f32 %v18_v0, %v37_v2  ;;  %v67_v35 = vand.u32 4294901760, %v1400_v28  ;;  %v1435_v39 = vld [vmem:[%s1647_s1 + $0x68] sm:$0xff]  ;;  %v1458_v47 = vld [vmem:[%s1647_s1 + $0x70] sm:$0xff]  ;;  %v1463_v48 = vld [vmem:[%s1647_s1 + $0x78] sm:$0xff] }
   0x7   :  { %1060 = vmatpush3.bf16.msra.mxu1 %v1336_v10  ;;  %1156 = vmatpush3.bf16.msra.mxu0 %v1336_v10  ;;  %v1410_v32 = vsub.f32 %v19_v1, %v40_v3  ;;  %v1423_v34 = vpack.c.bf16 %v64_v26, %v61_v25  ;;  %v70_v36 = vand.u32 4294901760, %v1405_v29  ;;  %v1439_v42 = vand.u32 4294901760, %v17_v33 }
   0x8   :  { %1062 = vmatprep.subr.bf16.mxu1 %v1340_v13  ;;  %1158 = vmatprep.subr.bf16.mxu0 %v1340_v13  ;;  %v119_v27 = vand.u32 4294901760, %v1382_v23  ;;  %v140_v40 = vand.u32 4294901760, %v1408_v31  ;;  %v1443_v43 = vsub.f32 %v20_v4, %v43_v7  ;;  %v73_v45 = vand.u32 4294901760, %v1430_v38 }
   0x9   :  { %v147_v41 = vand.u32 4294901760, %v1410_v32  ;;  %v1451_v44 = vpack.c.bf16 %v70_v36, %v67_v35  ;;  %v76_v46 = vand.u32 4294901760, %v1435_v39  ;;  %v1466_v49 = vsub.f32 %v1323_v5, %v46_v8 }
   0xa   :  { %v120_v30 = vsub.f32 %v1382_v23, %v119_v27  ;;  %984 = vmatprep.mubr.f32.mxu0 %v119_v27  ;;  %v141_v50 = vsub.f32 %v1408_v31, %v140_v40  ;;  %v1471_v52 = vsub.f32 %v17_v33, %v1439_v42  ;;  %v79_v53 = vand.u32 4294901760, %v1458_v47 }
   0xb   :  { %1064 = vmatpush3.bf16.msra.mxu1 %v1340_v13  ;;  %1160 = vmatpush3.bf16.msra.mxu0 %v1340_v13  ;;  %v148_v51 = vsub.f32 %v1410_v32, %v147_v41  ;;  %v82_v54 = vand.u32 4294901760, %v1463_v48  ;;  %v154_v55 = vand.u32 4294901760, %v1443_v43  ;;  %v1481_v56 = vsub.f32 %v1328_v6, %v49_v11 }
   0xc   :  { %1066 = vmatprep.subr.bf16.mxu1 %v1365_v17  ;;  %1162 = vmatprep.subr.bf16.mxu0 %v1365_v17  ;;  %v121_v37 = vand.u32 4294901760, %v120_v30  ;;  %v1489_v57 = vpack.c.bf16 %v76_v46, %v73_v45  ;;  %v161_v58 = vand.u32 4294901760, %v1466_v49  ;;  %v1495_v59 = vsub.f32 %v1334_v9, %v52_v12 }
   0xd   :  { %v142_v60 = vand.u32 4294901760, %v141_v50  ;;  %v149_v61 = vand.u32 4294901760, %v148_v51  ;;  %v129_v62 = vand.u32 4294901760, %v1471_v52  ;;  %v1504_v63 = vpack.c.bf16 %v82_v54, %v79_v53 }
   0xe   :  { %879 = vmatprep.mubr.f32.mxu1 %v121_v37  ;;  %v155_v0 = vsub.f32 %v1443_v43, %v154_v55  ;;  %v168_v1 = vand.u32 4294901760, %v1481_v56  ;;  %v162_v2 = vsub.f32 %v1466_v49, %v161_v58  ;;  %v175_v3 = vand.u32 4294901760, %v1495_v59 }
   0xf   :  { %1068 = vmatpush3.bf16.msra.mxu1 %v1365_v17  ;;  %1164 = vmatpush3.bf16.msra.mxu0 %v1365_v17  ;;  %v1515_v4 = vsub.f32 %v1345_v14, %v55_v18  ;;  %v1520_v5 = vsub.f32 %v1350_v15, %v58_v19  ;;  %v1089_v6 = vpack.c.bf16 %v149_v61, %v142_v60 }
  0x10   :  { %1070 = vmatprep.subr.bf16.mxu1 %v1392_v24  ;;  %1166 = vmatprep.subr.bf16.mxu0 %v1392_v24  ;;  %v1185_v7 = vpack.c.bf16 %v147_v41, %v140_v40  ;;  %v130_v8 = vsub.f32 %v1471_v52, %v129_v62  ;;  %v156_v9 = vand.u32 4294901760, %v155_v0  ;;  %v169_v11 = vsub.f32 %v1481_v56, %v168_v1 }
  0x11   :  { %v1529_v12 = vsub.f32 %v1374_v21, %v61_v25  ;;  %v1534_v14 = vsub.f32 %v1379_v22, %v64_v26  ;;  %v163_v15 = vand.u32 4294901760, %v162_v2  ;;  %v176_v16 = vsub.f32 %v1495_v59, %v175_v3 }
  0x12   :  { %v182_v18 = vand.u32 4294901760, %v1515_v4  ;;  %v189_v19 = vand.u32 4294901760, %v1520_v5  ;;  %v131_v27 = vand.u32 4294901760, %v130_v8  ;;  %v1189_v30 = vpack.c.bf16 %v161_v58, %v154_v55 }
  0x13   :  { %1072 = vmatpush3.bf16.msra.mxu1 %v1392_v24  ;;  %1168 = vmatpush3.bf16.msra.mxu0 %v1392_v24  ;;  %v1544_v21 = vsub.f32 %v1400_v28, %v67_v35  ;;  %v170_v22 = vand.u32 4294901760, %v169_v11  ;;  %v196_v25 = vand.u32 4294901760, %v1529_v12  ;;  %v203_v26 = vand.u32 4294901760, %v1534_v14 }
  0x14   :  { %1074 = vmatprep.subr.bf16.mxu1 %v1423_v34  ;;  %1170 = vmatprep.subr.bf16.mxu0 %v1423_v34  ;;  %v1553_v33 = vsub.f32 %v1405_v29, %v70_v36  ;;  %v1093_v37 = vpack.c.bf16 %v163_v15, %v156_v9  ;;  %v177_v40 = vand.u32 4294901760, %v176_v16  ;;  %v183_v28 = vsub.f32 %v1515_v4, %v182_v18 }
  0x15   :  { %v190_v35 = vsub.f32 %v1520_v5, %v189_v19  ;;  %v1193_v41 = vpack.c.bf16 %v175_v3, %v168_v1  ;;  %v210_v50 = vand.u32 4294901760, %v1544_v21  ;;  %v197_v51 = vsub.f32 %v1529_v12, %v196_v25 }
  0x16   :  { %v204_v29 = vsub.f32 %v1534_v14, %v203_v26  ;;  %v217_v36 = vand.u32 4294901760, %v1553_v33  ;;  %v1564_v55 = vsub.f32 %v1430_v38, %v73_v45  ;;  %v1097_v58 = vpack.c.bf16 %v177_v40, %v170_v22 }
  0x17   :  { %1076 = vmatpush3.bf16.msra.mxu1 %v1423_v34  ;;  %1172 = vmatpush3.bf16.msra.mxu0 %v1423_v34  ;;  %v184_v60 = vand.u32 4294901760, %v183_v28  ;;  %v191_v61 = vand.u32 4294901760, %v190_v35  ;;  %v1197_v0 = vpack.c.bf16 %v189_v19, %v182_v18  ;;  %v211_v1 = vsub.f32 %v1544_v21, %v210_v50 }
  0x18   :  { %1078 = vmatprep.subr.bf16.mxu1 %v1451_v44  ;;  %1174 = vmatprep.subr.bf16.mxu0 %v1451_v44  ;;  %v198_v38 = vand.u32 4294901760, %v197_v51  ;;  %v205_v45 = vand.u32 4294901760, %v204_v29  ;;  %v218_v2 = vsub.f32 %v1553_v33, %v217_v36  ;;  %v224_v3 = vand.u32 4294901760, %v1564_v55 }
  0x19   :  { %v1201_v9 = vpack.c.bf16 %v203_v26, %v196_v25  ;;  %v212_v11 = vand.u32 4294901760, %v211_v1 }
  0x1a   :  { %v1105_v8 = vpack.c.bf16 %v205_v45, %v198_v38  ;;  %v219_v15 = vand.u32 4294901760, %v218_v2  ;;  %v225_v16 = vsub.f32 %v1564_v55, %v224_v3 }
  0x1b   :  { %1080 = vmatpush3.bf16.msra.mxu1 %v1451_v44  ;;  %1176 = vmatpush3.bf16.msra.mxu0 %v1451_v44 }
  0x1c   :  { %1082 = vmatprep.subr.bf16.mxu1 %v1489_v57  ;;  %1178 = vmatprep.subr.bf16.mxu0 %v1489_v57  ;;  %v226_v19 = vand.u32 4294901760, %v225_v16 }
  0x1f   :  { %1084 = vmatpush3.bf16.msra.mxu1 %v1489_v57  ;;  %1180 = vmatpush3.bf16.msra.mxu0 %v1489_v57 }
  0x20   :  { %1086 = vmatprep.subr.bf16.mxu1 %v1504_v63  ;;  %1182 = vmatprep.subr.bf16.mxu0 %v1504_v63 }
  0x23   :  { %1088 = vmatpush3.bf16.msra.mxu1 %v1504_v63  ;;  %1184 = vmatpush3.bf16.msra.mxu0 %v1504_v63 }
  0x24   :  { %1090 = vmatprep.subr.bf16.mxu1 %v1089_v6  ;;  %1186 = vmatprep.subr.bf16.mxu0 %v1185_v7 }
  0x26   :  { %880 = vmatmul.mubr.f32.vlgmr.msra.gmra.mrb[0].mxu1 %v131_v27  ;;  %985 = vmatmul.mubr.f32.vlgmr.msra.gmra.mrb[0].mxu0 %v129_v62  ;;  %v1569_v62 = vsub.f32 %v1435_v39, %v76_v46  ;;  %v1580_v46 = vsub.f32 %v1458_v47, %v79_v53 }
  0x27   :  { %1092 = vmatpush3.bf16.msra.mxu1 %v1089_v6  ;;  %1188 = vmatpush3.bf16.msra.mxu0 %v1185_v7  ;;  %v1101_v6 = vpack.c.bf16 %v191_v61, %v184_v60  ;;  %v1585_v7 = vsub.f32 %v1463_v48, %v82_v54  ;;  %v1109_v48 = vpack.c.bf16 %v219_v15, %v212_v11 }
  0x28   :  { %1094 = vmatprep.subr.bf16.mxu1 %v1093_v37  ;;  %1190 = vmatprep.subr.bf16.mxu0 %v1189_v30  ;;  %v231_v39 = vand.u32 4294901760, %v1569_v62  ;;  %v238_v47 = vand.u32 4294901760, %v1580_v46  ;;  %v1205_v54 = vpack.c.bf16 %v217_v36, %v210_v50  ;;  %v1125_v50 = vpack.c.bf16 %v1466_v49, %v1443_v43 }
  0x29   :  { %914 = vmatprep.mubr.f32.mxu1 %v1369_v20  ;;  %1019 = vmatprep.mubr.f32.mxu0 %v1369_v20  ;;  %v245_v53 = vand.u32 4294901760, %v1585_v7 }
  0x2a   :  { %v232_v18 = vsub.f32 %v1569_v62, %v231_v39  ;;  %v1209_v26 = vpack.c.bf16 %v231_v39, %v224_v3 }
  0x2b   :  { %1096 = vmatpush3.bf16.msra.mxu1 %v1093_v37  ;;  %1192 = vmatpush3.bf16.msra.mxu0 %v1189_v30  ;;  %v239_v30 = vsub.f32 %v1580_v46, %v238_v47  ;;  %v246_v22 = vsub.f32 %v1585_v7, %v245_v53  ;;  %v1213_v35 = vpack.c.bf16 %v245_v53, %v238_v47 }
  0x2c   :  { %1098 = vmatprep.subr.bf16.mxu1 %v1097_v58  ;;  %1194 = vmatprep.subr.bf16.mxu0 %v1193_v41  ;;  %v233_v27 = vand.u32 4294901760, %v232_v18 }
  0x2d   :  { %v240_v37 = vand.u32 4294901760, %v239_v30  ;;  %v247_v40 = vand.u32 4294901760, %v246_v22 }
  0x2e   :  { %v1113_v25 = vpack.c.bf16 %v233_v27, %v226_v19 }
  0x2f   :  { %1100 = vmatpush3.bf16.msra.mxu1 %v1097_v58  ;;  %1196 = vmatpush3.bf16.msra.mxu0 %v1193_v41  ;;  %v1117_v28 = vpack.c.bf16 %v247_v40, %v240_v37  ;;  %v1121_v41 = vpack.c.bf16 %v1410_v32, %v1408_v31  ;;  %v1129_v31 = vpack.c.bf16 %v1495_v59, %v1481_v56 }
  0x30   :  { %1102 = vmatprep.subr.bf16.mxu1 %v1101_v6  ;;  %1198 = vmatprep.subr.bf16.mxu0 %v1197_v0  ;;  %v1133_v32 = vpack.c.bf16 %v1520_v5, %v1515_v4 }
  0x33   :  { %1104 = vmatpush3.bf16.msra.mxu1 %v1101_v6  ;;  %1200 = vmatpush3.bf16.msra.mxu0 %v1197_v0 }
  0x34   :  { %1106 = vmatprep.subr.bf16.mxu1 %v1105_v8  ;;  %1202 = vmatprep.subr.bf16.mxu0 %v1201_v9 }
  0x37   :  { %1108 = vmatpush3.bf16.msra.mxu1 %v1105_v8  ;;  %1204 = vmatpush3.bf16.msra.mxu0 %v1201_v9 }
  0x38   :  { %1110 = vmatprep.subr.bf16.mxu1 %v1109_v48  ;;  %1206 = vmatprep.subr.bf16.mxu0 %v1205_v54 }
  0x3b   :  { %1112 = vmatpush3.bf16.msra.mxu1 %v1109_v48  ;;  %1208 = vmatpush3.bf16.msra.mxu0 %v1205_v54 }
  0x3c   :  { %1114 = vmatprep.subr.bf16.mxu1 %v1113_v25  ;;  %1210 = vmatprep.subr.bf16.mxu0 %v1209_v26 }
  0x3f   :  { %1116 = vmatpush3.bf16.msra.mxu1 %v1113_v25  ;;  %1212 = vmatpush3.bf16.msra.mxu0 %v1209_v26 }
  0x40   :  { %1118 = vmatprep.subr.bf16.mxu1 %v1117_v28  ;;  %1214 = vmatprep.subr.bf16.mxu0 %v1213_v35 }
  0x43   :  { %1120 = vmatpush3.bf16.msra.mxu1 %v1117_v28  ;;  %1216 = vmatpush3.bf16.msra.mxu0 %v1213_v35 }
  0x44   :  { %1122 = vmatprep.subr.bf16.mxu1 %v1121_v41  ;;  %1218 = vmatprep.subr.bf16.mxu0 %v1336_v10 }
  0x46   :  { %915 = vmatmul.mubr.f32.vlgmr.msra.gmra.mrb[0].mxu1 %v1439_v42  ;;  %1020 = vmatmul.mubr.f32.vlgmr.msra.gmra.mrb[0].mxu0 %v1439_v42 }
  0x47   :  { %1124 = vmatpush3.bf16.msra.mxu1 %v1121_v41  ;;  %1220 = vmatpush3.bf16.msra.mxu0 %v1336_v10  ;;  %v1137_v10 = vpack.c.bf16 %v1534_v14, %v1529_v12 }
  0x48   :  { %1126 = vmatprep.subr.bf16.mxu1 %v1125_v50  ;;  %1222 = vmatprep.subr.bf16.mxu0 %v1340_v13 }
  0x49   :  { %949 = vmatprep.mubr.f32.mxu1 %v1382_v23  ;;  %1054 = vmatprep.mubr.f32.mxu0 %v1369_v20  ;;  %v1149_v20 = vpack.c.bf16 %v1585_v7, %v1580_v46  ;;  %v35_v23 = vstv %s1648_s2 }
  0x4b   :  { %1128 = vmatpush3.bf16.msra.mxu1 %v1125_v50  ;;  %1224 = vmatpush3.bf16.msra.mxu0 %v1340_v13  ;;  %v1141_v13 = vpack.c.bf16 %v1553_v33, %v1544_v21 }
  0x4c   :  { %1130 = vmatprep.subr.bf16.mxu1 %v1129_v31  ;;  %1226 = vmatprep.subr.bf16.mxu0 %v1365_v17 }
  0x4f   :  { %1132 = vmatpush3.bf16.msra.mxu1 %v1129_v31  ;;  %1228 = vmatpush3.bf16.msra.mxu0 %v1365_v17  ;;  %v1145_v17 = vpack.c.bf16 %v1569_v62, %v1564_v55 }
  0x50   :  { %1134 = vmatprep.subr.bf16.mxu1 %v1133_v32  ;;  %1230 = vmatprep.subr.bf16.mxu0 %v1392_v24 }
  0x53   :  { %1136 = vmatpush3.bf16.msra.mxu1 %v1133_v32  ;;  %1232 = vmatpush3.bf16.msra.mxu0 %v1392_v24 }
  0x54   :  { %1138 = vmatprep.subr.bf16.mxu1 %v1137_v10  ;;  %1234 = vmatprep.subr.bf16.mxu0 %v1423_v34 }
  0x57   :  { %1140 = vmatpush3.bf16.msra.mxu1 %v1137_v10  ;;  %1236 = vmatpush3.bf16.msra.mxu0 %v1423_v34 }
  0x58   :  { %1142 = vmatprep.subr.bf16.mxu1 %v1141_v13  ;;  %1238 = vmatprep.subr.bf16.mxu0 %v1451_v44 }
  0x5b   :  { %1144 = vmatpush3.bf16.msra.mxu1 %v1141_v13  ;;  %1240 = vmatpush3.bf16.msra.mxu0 %v1451_v44 }
  0x5c   :  { %1146 = vmatprep.subr.bf16.mxu1 %v1145_v17  ;;  %1242 = vmatprep.subr.bf16.mxu0 %v1489_v57 }
  0x5f   :  { %1148 = vmatpush3.bf16.msra.mxu1 %v1145_v17  ;;  %1244 = vmatpush3.bf16.msra.mxu0 %v1489_v57 }
  0x60   :  { %1150 = vmatprep.subr.bf16.mxu1 %v1149_v20  ;;  %1246 = vmatprep.subr.bf16.mxu0 %v1504_v63 }
  0x63   :  { %1152 = vmatpush3.bf16.msra.mxu1 %v1149_v20  ;;  %1248 = vmatpush3.bf16.msra.mxu0 %v1504_v63 }
  0x66   :  { %950 = vmatmul.mubr.f32.vlgmr.msra.gmra.mrb[0].mxu1 %v1471_v52  ;;  %1055 = vmatmul.mubr.f32.vlgmr.msra.gmra.mrb[0].mxu0 %v1439_v42 }
 0x139   :  { %v951_v24 = vpop.f32.mrb[0].mxu1  ;;  %v1056_v34 = vpop.f32.mrb[0].mxu0 }
 0x13a   :  { %v1249_v43 = vadd.f32 %v951_v24, %v35_v23  ;;  %v394_v44 = vpop.f32.mrb[1].mxu1  ;;  %v710_v49 = vpop.f32.mrb[1].mxu0 }
 0x13b   :  { %v1251_v56 = vadd.f32 %v394_v44, %v35_v23 }
 0x13c   :  { %v1250_v57 = vadd.f32 %v1249_v43, %v1056_v34 }
 0x13d   :  { %v1252_v59 = vadd.f32 %v1251_v56, %v710_v49 }
 0x13e   :  { %722 = vst.msk [vmem:[#allocation3 + $0x8] sm:$0xff] %vm720_vm0, %v1250_v57 }
 0x13f   :  { %721 = vst.msk [vmem:[#allocation3] sm:$0xff] %vm720_vm0, %v1252_v59 }
 0x140   :  { %727 = vsyncadd [#allocation4], 224  ;;  %s1288_s21 = smov [#allocation3]  }
 0x141   :  { %s728_s22 = sshll.u32 %s1288_s21, 4  ;;  %s729_s22 = int_to_ptr.vmem [resolvable:$true] %s728_s22 }
 0x142   :  { %s1264_s23 = scalar_lea.vmem %s729_s22, 32  ;;  %s1268_s24 = scalar_lea.vmem %s729_s22, 256 }
 0x143   :  { %p1265_p0 = scmp.ne.s32.totalorder %s729_s22, %s1264_s23  ;;  %p1269_p1 = scmp.lt.s32.totalorder %s729_s22, %s729_s22 }
 0x144   :  { %p1270_p2 = scmp.lt.s32.totalorder %s1268_s24, %s1264_s23 }
 0x146   :  { %p1271_p3 = por %p1270_p2, %p1269_p1 }
 0x148   :  { %p1272_p4 = pnand %p1271_p3, %p1265_p0 }
 0x14a   :  { %1275 = shalt.err (!%p1272_p4)
}
 0x14b   :  { %s1276_s26 = scalar_lea.hbm %s1649_s3, 32 }
 0x14c   :  { %p1277_p5 = scmp.ne.s32.totalorder %s1649_s3, %s1276_s26  ;;  %p1280_p6 = scmp.lt.u32.totalorder %s1276_s26, %s1649_s3 }
 0x14e   :  { %p1282_p7 = pnand %p1280_p6, %p1277_p5 }
 0x150   :  { %1285 = shalt.err (!%p1282_p7)
}
 0x151   :  { %s1289_s4 = smov 32   ;;  %s1290_s5 = smov 2  }
 0x152   :  { %734 = dma.vmem_to_hbm [thread:$0]  %s729_s22, 32, %s1649_s3, [#allocation4], %s1289_s4, %s1289_s4, %s1290_s5  }
 0x153   :  { %1286 = dma.done.wait [#allocation4], 256  }
 0x154   :  { %1287 = vsyncadd [#allocation4], 4294967040 }
 0x155   :  { %738 = vsyncpa [#allocation4], 1 }

</bundles_post_ra>
